<compile_context>
chip_gen: v6e
topology: v6e:2x2x1
jax: 0.10.0
libtpu: 0.0.40
codegen_flags: <defaults>
</compile_context>

<pallas_src>
import functools

import jax
import jax.numpy as jnp
from jax.experimental import pallas as pl
from jax.experimental.pallas import tpu as pltpu


def _pick_tile(total, target, align):
    """Largest multiple of `align` that divides `total` and is <= `target`,
    falling back to the full extent (a full-dim block is always legal)."""
    if total <= target:
        return total
    t = (target // align) * align
    while t >= align:
        if total % t == 0:
            return t
        t -= align
    return total


def _mlp_kernel(x_ref, wgu_ref, wd_ref, o_ref, acc_ref, *, ti):
    # x_ref  : (tm, H)       resident token tile (constant over the I axis)
    # wgu_ref: (H, 2*ti)     interleaved [gate_tile | up_tile] weight slab
    # wd_ref : (ti, H)       down_proj weight tile
    # o_ref  : (tm, H)       output tile (written once, at the last I block)
    # acc_ref: (tm, H) f32   VMEM accumulator for down-proj partial sums
    j = pl.program_id(1)

    @pl.when(j == 0)
    def _():
        acc_ref[...] = jnp.zeros_like(acc_ref)

    x = x_ref[...]
    # Fused gate+up: one (tm, H) x (H, 2*ti) MXU matmul per I tile.
    gu = jnp.dot(x, wgu_ref[...], preferred_element_type=jnp.float32)
    gate = gu[:, :ti]
    up = gu[:, ti:]
    # SiLU and gating in f32 (VPU/EUP).
    h = (gate * jax.nn.sigmoid(gate)) * up
    # Partial down-projection for this I tile, accumulated in f32.
    acc_ref[...] += jnp.dot(h.astype(wd_ref.dtype), wd_ref[...],
                            preferred_element_type=jnp.float32)

    @pl.when(j == pl.num_programs(1) - 1)
    def _():
        o_ref[...] = acc_ref[...].astype(o_ref.dtype)


@functools.partial(jax.jit, static_argnames=("tm_target", "ti_target"))
def mlp_pallas(x, w_gate, w_up, w_down, *, tm_target=256, ti_target=512):
    """x: (B, S, H); weights pre-transposed to (in, out). Returns (B, S, H)."""
    B, S, H = x.shape
    I = w_gate.shape[1]
    M = B * S
    x2d = x.reshape(M, H)

    tm = _pick_tile(M, tm_target, 8)      # token tile (multiple of 8 sublanes)
    ti = _pick_tile(I, ti_target, 128)    # intermediate tile (lane-aligned)
    n_i = I // ti

    # Interleave gate/up per I-tile so each grid step streams ONE contiguous
    # (H, 2*ti) slab and runs a single wider first-stage matmul.
    w_gu = jnp.concatenate(
        [w_gate.reshape(H, n_i, ti), w_up.reshape(H, n_i, ti)], axis=2
    ).reshape(H, 2 * I)

    x_bytes = jnp.dtype(x.dtype).itemsize
    w_bytes = jnp.dtype(w_gate.dtype).itemsize
    cost = pl.CostEstimate(
        flops=6 * M * H * I,                         # gate + up + down matmuls
        transcendentals=M * I,                       # sigmoid
        bytes_accessed=2 * M * H * x_bytes + 3 * H * I * w_bytes,
    )

    kernel = functools.partial(_mlp_kernel, ti=ti)
    out2d = pl.pallas_call(
        kernel,
        out_shape=jax.ShapeDtypeStruct((M, H), x.dtype),
        grid_spec=pltpu.PrefetchScalarGridSpec(
            num_scalar_prefetch=0,
            grid=(M // tm, n_i),                     # reduction (I) axis last
            in_specs=[
                pl.BlockSpec((tm, H), lambda i, j: (i, 0)),       # x, resident over j
                pl.BlockSpec((H, 2 * ti), lambda i, j: (0, j)),   # fused gate|up tile
                pl.BlockSpec((ti, H), lambda i, j: (j, 0)),       # down tile
            ],
            out_specs=pl.BlockSpec((tm, H), lambda i, j: (i, 0)),  # accumulator pattern
            scratch_shapes=[pltpu.VMEM((tm, H), jnp.float32)],
        ),
        compiler_params=pltpu.CompilerParams(
            dimension_semantics=("parallel", "arbitrary"),
            # Tile plan (tm<=256, ti<=512, double-buffered weight slabs) stays
            # under ~48 MiB even in bf16 at Llama sizes, so one limit fits
            # v5e/v6e (128 MiB physical) and v7x (64 MiB physical).
            vmem_limit_bytes=64 << 20,
        ),
        cost_estimate=cost,
    )(x2d, w_gu, w_down)

    return out2d.reshape(B, S, H)


def mlp_reference(x, w_gate, w_up, w_down):
    g = jnp.einsum("bsh,hi->bsi", x, w_gate)
    u = jnp.einsum("bsh,hi->bsi", x, w_up)
    h = (g * jax.nn.sigmoid(g)) * u
    return jnp.einsum("bsi,ih->bsh", h, w_down)


if __name__ == "__main__":
    # Small LlamaConfig-like sizes.
    batch, seq = 2, 8
    hidden_size = 32
    intermediate_size = 64
    dtype = jnp.float32

    key = jax.random.PRNGKey(0)
    kx, kg, ku, kd = jax.random.split(key, 4)

    x = jax.random.normal(kx, (batch, seq, hidden_size), dtype=dtype)
    # PyTorch weights would be (out, in); we keep them transposed (in, out).
    w_gate = (jax.random.normal(kg, (hidden_size, intermediate_size), dtype=dtype)
              * (1.0 / hidden_size ** 0.5))
    w_up = (jax.random.normal(ku, (hidden_size, intermediate_size), dtype=dtype)
            * (1.0 / hidden_size ** 0.5))
    w_down = (jax.random.normal(kd, (intermediate_size, hidden_size), dtype=dtype)
              * (1.0 / intermediate_size ** 0.5))

    out = mlp_pallas(x, w_gate, w_up, w_down)
    jax.block_until_ready(out)

    ref = mlp_reference(x, w_gate, w_up, w_down)
    assert out.shape == (batch, seq, hidden_size)
    assert jnp.allclose(out, ref, atol=2e-3, rtol=2e-3), "mismatch vs reference"

    print("KERNEL_OK")
</pallas_src>

<mosaic_0001>
module attributes {stable_mosaic.version = 11 : i64} {
  func.func @_mlp_kernel(%arg0: i32, %arg1: i32, %arg2: memref<16x32xf32, #tpu.memory_space<vmem>>, %arg3: memref<32x128xf32, #tpu.memory_space<vmem>>, %arg4: memref<64x32xf32, #tpu.memory_space<vmem>>, %arg5: memref<16x32xf32, #tpu.memory_space<vmem>>, %arg6: memref<16x32xf32, #tpu.memory_space<vmem>>) attributes {dimension_semantics = [#tpu.dimension_semantics<parallel>, #tpu.dimension_semantics<arbitrary>], iteration_bounds = array<i64: 1, 1>, scalar_prefetch = 0 : i64, scratch_operands = 1 : i64, tpu.core_type = #tpu.core_type<tc>, window_params = [{transform_indices = @transform_0, window_bounds = array<i64: 16, 32>}, {transform_indices = @transform_1, window_bounds = array<i64: 32, 128>}, {transform_indices = @transform_2, window_bounds = array<i64: 64, 32>}, {transform_indices = @transform_3, window_bounds = array<i64: 16, 32>}]} {
    %c0_i32 = arith.constant 0 : i32
    %0 = arith.cmpi eq, %arg1, %c0_i32 : i32
    %1 = arith.extui %0 : i1 to i32
    %c0_i32_0 = arith.constant 0 : i32
    %2 = arith.cmpi ne, %1, %c0_i32_0 : i32
    scf.if %2 {
      %cst_14 = arith.constant 0.000000e+00 : f32
      %23 = vector.broadcast %cst_14 : f32 to vector<16x32xf32>
      %c0_15 = arith.constant 0 : index
      %c0_16 = arith.constant 0 : index
      %24 = vector.load %arg6[%c0_15, %c0_16] : memref<16x32xf32, #tpu.memory_space<vmem>>, vector<16x32xf32>
      tpu.vector_store %arg6[%c0_15, %c0_16], %23 {strides = array<i32>} : memref<16x32xf32, #tpu.memory_space<vmem>>, vector<16x32xf32>,
    } else {
    }
    %c0 = arith.constant 0 : index
    %c0_1 = arith.constant 0 : index
    %3 = vector.load %arg2[%c0, %c0_1] : memref<16x32xf32, #tpu.memory_space<vmem>>, vector<16x32xf32>
    %c0_2 = arith.constant 0 : index
    %c0_3 = arith.constant 0 : index
    %4 = vector.load %arg3[%c0_2, %c0_3] : memref<32x128xf32, #tpu.memory_space<vmem>>, vector<32x128xf32>
    %cst = arith.constant dense<0.000000e+00> : vector<16x128xf32>
    %5 = tpu.matmul %3, %4, %cst {dimension_numbers = #tpu.dot_dimension_numbers<[1], [0], [0], [1], [0, 0, 1, 1], [], []>} : vector<16x32xf32>, vector<32x128xf32>, vector<16x128xf32> -> vector<16x128xf32>
    %6 = vector.extract_strided_slice %5 {offsets = [0, 0], sizes = [16, 64], strides = [1, 1]} : vector<16x128xf32> to vector<16x64xf32>
    %7 = vector.extract_strided_slice %5 {offsets = [0, 64], sizes = [16, 64], strides = [1, 1]} : vector<16x128xf32> to vector<16x64xf32>
    %8 = arith.negf %6 : vector<16x64xf32>
    %9 = math.exp %8 : vector<16x64xf32>
    %cst_4 = arith.constant 1.000000e+00 : f32
    %10 = vector.broadcast %cst_4 : f32 to vector<16x64xf32>
    %11 = arith.addf %10, %9 : vector<16x64xf32>
    %12 = arith.divf %10, %11 : vector<16x64xf32>
    %13 = arith.mulf %6, %12 : vector<16x64xf32>
    %14 = arith.mulf %13, %7 : vector<16x64xf32>
    %c0_5 = arith.constant 0 : index
    %c0_6 = arith.constant 0 : index
    %15 = vector.load %arg6[%c0_5, %c0_6] : memref<16x32xf32, #tpu.memory_space<vmem>>, vector<16x32xf32>
    %c0_7 = arith.constant 0 : index
    %c0_8 = arith.constant 0 : index
    %16 = vector.load %arg4[%c0_7, %c0_8] : memref<64x32xf32, #tpu.memory_space<vmem>>, vector<64x32xf32>
    %cst_9 = arith.constant dense<0.000000e+00> : vector<16x32xf32>
    %17 = tpu.matmul %14, %16, %cst_9 {dimension_numbers = #tpu.dot_dimension_numbers<[1], [0], [0], [1], [0, 0, 1, 1], [], []>} : vector<16x64xf32>, vector<64x32xf32>, vector<16x32xf32> -> vector<16x32xf32>
    %18 = arith.addf %15, %17 : vector<16x32xf32>
    %c0_10 = arith.constant 0 : index
    %c0_11 = arith.constant 0 : index
    %19 = vector.load %arg6[%c0_10, %c0_11] : memref<16x32xf32, #tpu.memory_space<vmem>>, vector<16x32xf32>
    tpu.vector_store %arg6[%c0_10, %c0_11], %18 {strides = array<i32>} : memref<16x32xf32, #tpu.memory_space<vmem>>, vector<16x32xf32>,
    %c0_i32_12 = arith.constant 0 : i32
    %20 = arith.cmpi eq, %arg1, %c0_i32_12 : i32
    %21 = arith.extui %20 : i1 to i32
    %c0_i32_13 = arith.constant 0 : i32
    %22 = arith.cmpi ne, %21, %c0_i32_13 : i32
    scf.if %22 {
      %c0_14 = arith.constant 0 : index
      %c0_15 = arith.constant 0 : index
      %23 = vector.load %arg6[%c0_14, %c0_15] : memref<16x32xf32, #tpu.memory_space<vmem>>, vector<16x32xf32>
      %c0_16 = arith.constant 0 : index
      %c0_17 = arith.constant 0 : index
      %24 = vector.load %arg5[%c0_16, %c0_17] : memref<16x32xf32, #tpu.memory_space<vmem>>, vector<16x32xf32>
      tpu.vector_store %arg5[%c0_16, %c0_17], %23 {strides = array<i32>} : memref<16x32xf32, #tpu.memory_space<vmem>>, vector<16x32xf32>,
    } else {
    }
    return
  }
  func.func @transform_0(%arg0: i32, %arg1: i32) -> (i32, i32) {
    %c0_i32 = arith.constant 0 : i32
    %c0_i32_0 = arith.constant 0 : i32
    return %arg0, %c0_i32 : i32, i32
  }
  func.func @transform_1(%arg0: i32, %arg1: i32) -> (i32, i32) {
    %c0_i32 = arith.constant 0 : i32
    %c0_i32_0 = arith.constant 0 : i32
    return %c0_i32, %arg1 : i32, i32
  }
  func.func @transform_2(%arg0: i32, %arg1: i32) -> (i32, i32) {
    %c0_i32 = arith.constant 0 : i32
    %c0_i32_0 = arith.constant 0 : i32
    return %arg1, %c0_i32 : i32, i32
  }
  func.func @transform_3(%arg0: i32, %arg1: i32) -> (i32, i32) {
    %c0_i32 = arith.constant 0 : i32
    %c0_i32_0 = arith.constant 0 : i32
    return %arg0, %c0_i32 : i32, i32
  }
}

</mosaic_0001>

<bundles_post_ra>
// kernel: mlp_pallas.1
= control target key start
LH: loop header
LB: loop body
LE: loop exit
PB: predicated region body
PF: predicated region fallthrough
CT: control target
= control target key end

     0   :  { %vm19_vm0 = vcmask 261120   ;;  %s418_s0 = inlined_call_operand.vmem [shape: f32[16,32], index: 0, kind: input, shape index: {}]   ;;  %s419_s1 = inlined_call_operand.vmem [shape: f32[32,128], index: 1, kind: input, shape index: {}]   ;;  %s420_s2 = inlined_call_operand.vmem [shape: f32[64,32], index: 2, kind: input, shape index: {}]   ;;  %s421_s3 = inlined_call_operand.hbm [shape: f32[16,32], index: 3, kind: output, shape index: {}]  }
   0x1   :  { %v27_v0 = vld [vmem:[%s419_s1 + $0x18] sm:$0xff]  ;;  %v26_v1 = vld [vmem:[%s419_s1 + $0x10] sm:$0xff]  ;;  %v22_v2 = vld [vmem:[%s418_s0] sm:$0xff] }
   0x2   :  { %275 = vmatprep.subr.mxu0 %v27_v0  ;;  %v25_v3 = vld [vmem:[%s419_s1 + $0x8] sm:$0xff]  ;;  %283 = vmatprep.mubr.msk.f32.mxu0 %vm19_vm0, %v22_v2 }
   0x3   :  { %276 = vmatpush3.msra.mxu0 %v27_v0 }
   0x4   :  { %8 = vsyncpa [#allocation4], 0  ;;  %277 = vmatprep.subr.mxu0 %v26_v1  ;;  %v24_v4 = vld [vmem:[%s419_s1] sm:$0xff]  ;;  %v23_v5 = vld [vmem:[%s418_s0 + $0x8] sm:$0xff]  ;;  %v340_v14 = vmov 0.0   ;;  %s341_s11 = smov 64  }
   0x5   :  { %278 = vmatpush3.msra.mxu0 %v26_v1  ;;  %v143_v6 = vld [vmem:[%s420_s2 + $0x38] sm:$0xff]  ;;  %v142_v7 = vld [vmem:[%s420_s2 + $0x30] sm:$0xff]  ;;  %v141_v8 = vld [vmem:[%s420_s2 + $0x28] sm:$0xff]  ;;  %21 = vst.msk [vmem:[#allocation2 + $0x8] sm:$0xff] %vm19_vm0, %v340_v14  ;;  %vm144_vm1 = vcmask 523264  }
   0x6   :  { %279 = vmatprep.subr.mxu0 %v25_v3  ;;  %286 = vmatprep.subr.mxu1 %v143_v6  ;;  %v140_v9 = vld [vmem:[%s420_s2 + $0x20] sm:$0xff]  ;;  %v139_v10 = vld [vmem:[%s420_s2 + $0x18] sm:$0xff]  ;;  %v138_v11 = vld [vmem:[%s420_s2 + $0x10] sm:$0xff]  ;;  %20 = vst.msk [vmem:[#allocation2] sm:$0xff] %vm19_vm0, %v340_v14 }
   0x7   :  { %280 = vmatpush3.msra.mxu0 %v25_v3  ;;  %287 = vmatpush3.msra.mxu1 %v143_v6  ;;  %v137_v12 = vld [vmem:[%s420_s2 + $0x8] sm:$0xff]  ;;  %v136_v13 = vld [vmem:[%s420_s2] sm:$0xff]  ;;  %s342_s2 = smov [#allocation3]  }
   0x8   :  { %281 = vmatprep.subr.mxu0 %v24_v4  ;;  %288 = vmatprep.subr.mxu1 %v142_v7  ;;  %s242_s12 = sshll.u32 %s342_s2, 4  ;;  %s243_s12 = int_to_ptr.vmem [resolvable:$true] %s242_s12 }
   0x9   :  { %282 = vmatpush3.msra.mxu0 %v24_v4  ;;  %289 = vmatpush3.msra.mxu1 %v142_v7  ;;  %s318_s13 = scalar_lea.vmem %s243_s12, 256  ;;  %p323_p1 = scmp.lt.s32.totalorder %s243_s12, %s243_s12 }
   0xa   :  { %284 = vmatmul.mubr.msk.f32.vlgmr.msra.gmra.mxu0 %vm19_vm0, %v23_v5  ;;  %290 = vmatprep.subr.mxu1 %v141_v8  ;;  %p319_p0 = scmp.ne.s32.totalorder %s243_s12, %s318_s13  ;;  %p324_p2 = scmp.lt.s32.totalorder %s318_s13, %s318_s13 }
   0xb   :  { %291 = vmatpush3.msra.mxu1 %v141_v8 }
   0xc   :  { %292 = vmatprep.subr.mxu1 %v140_v9  ;;  %v135_v31 = vld [vmem:[#allocation2 + $0x8] sm:$0xff]  ;;  %p325_p3 = por %p324_p2, %p323_p1 }
   0xd   :  { %293 = vmatpush3.msra.mxu1 %v140_v9  ;;  %v134_v33 = vld [vmem:[#allocation2] sm:$0xff] }
   0xe   :  { %294 = vmatprep.subr.mxu1 %v139_v10  ;;  %p326_p4 = pnand %p325_p3, %p319_p0 }
   0xf   :  { %295 = vmatpush3.msra.mxu1 %v139_v10 }
  0x10   :  { %296 = vmatprep.subr.mxu1 %v138_v11 }
  0x11   :  { %297 = vmatpush3.msra.mxu1 %v138_v11 }
  0x12   :  { %298 = vmatprep.subr.mxu1 %v137_v12 }
  0x13   :  { %299 = vmatpush3.msra.mxu1 %v137_v12 }
  0x14   :  { %300 = vmatprep.subr.mxu1 %v136_v13 }
  0x15   :  { %301 = vmatpush3.msra.mxu1 %v136_v13 }
  0xca   :  { %v285_v15 = vpop.f32.mrf.mxu0 }
  0xcb   :  { %v256_v18 = vmul.f32 -1.442695, %v285_v15 }
  0xcc   :  { %v101_v16 = vpop.f32.mrf.mxu0 }
  0xcd   :  { %126 = vrot.lane.b32.xlu0 %v101_v16, %s341_s11  ;;  %v255_v17 = vmul.f32 -1.442695, %v101_v16 }
  0xcf   :  { %310 = vpow2.f32 %v255_v17 }
  0xd0   :  { %312 = vpow2.f32 %v256_v18 }
  0xd1   :  { %128 = vrot.lane.b32.xlu0 %v285_v15, %s341_s11 }
  0xdc   :  { %v311_v19 = vpop.eup %310 }
  0xdd   :  { %v116_v20 = vadd.f32 1.0, %v311_v19  ;;  %v313_v21 = vpop.eup %312 }
  0xde   :  { %v117_v22 = vadd.f32 1.0, %v313_v21 }
  0xdf   :  { %314 = vrcp.f32 %v116_v20 }
  0xe0   :  { %316 = vrcp.f32 %v117_v22 }
  0xec   :  { %v315_v23 = vpop.eup %314 }
  0xed   :  { %v122_v24 = vmul.f32 %v315_v23, %v101_v16  ;;  %v317_v25 = vpop.eup %316 }
  0xee   :  { %v123_v28 = vmul.f32 %v317_v25, %v285_v15 }
 0x13f   :  { %v127_v26 = vpop.permute.xlu0 %126 }
 0x140   :  { %v132_v27 = vmul.f32 %v127_v26, %v122_v24 }
 0x142   :  { %302 = vmatprep.mubr.msk.f32.mxu1 %vm144_vm1, %v132_v27 }
 0x143   :  { %v129_v29 = vpop.permute.xlu0 %128 }
 0x144   :  { %v133_v30 = vmul.f32 %v129_v29, %v123_v28 }
 0x146   :  { %303 = vmatmul.mubr.msk.f32.vlgmr.msra.gmra.mxu1 %vm144_vm1, %v133_v30 }
 0x206   :  { %v304_v32 = vpop.f32.mrf.mxu1 }
 0x207   :  { %v227_v34 = vadd.f32 %v304_v32, %v135_v31 }
 0x208   :  { %v217_v35 = vpop.f32.mrf.mxu1 }
 0x209   :  { %229 = vst.msk [vmem:[#allocation2 + $0x8] sm:$0xff] %vm19_vm0, %v227_v34  ;;  %v226_v36 = vadd.f32 %v217_v35, %v134_v33 }
 0x20b   :  { %228 = vst.msk [vmem:[#allocation2] sm:$0xff] %vm19_vm0, %v226_v36 }
 0x210   :  { %v234_v37 = vld [vmem:[#allocation2 + $0x8] sm:$0xff] }
 0x211   :  { %236 = vst.msk [vmem:[#allocation3 + $0x8] sm:$0xff] %vm19_vm0, %v234_v37 }
 0x212   :  { %v233_v38 = vld [vmem:[#allocation2] sm:$0xff] }
 0x213   :  { %235 = vst.msk [vmem:[#allocation3] sm:$0xff] %vm19_vm0, %v233_v38 }
 0x214   :  { %329 = shalt.err (!%p326_p4)
}
 0x215   :  { %s343_s14 = smov 128   ;;  %s344_s15 = smov 8  }
 0x216   :  { %248 = dma.vmem_to_hbm [thread:$0]  %s243_s12, 256, %s421_s3, [#allocation4], %s343_s14, %s343_s14, %s344_s15  }
 0x217   :  { %338 = dma.done.wait [#allocation4], 256  }
 0x218   :  { %339 = vsyncadd [#allocation4], 4294967040 }
 0x219   :  { %252 = vsyncpa [#allocation4], 1 }

</bundles_post_ra>
